<compile_context>
chip_gen: v7x
topology: tpu7x:2x2x1
jax: 0.10.0
libtpu: 0.0.40
codegen_flags: <defaults>
</compile_context>

<pallas_src>
import math

import jax
import jax.numpy as jnp
from jax.experimental import pallas as pl
from jax.experimental.pallas import tpu as pltpu

_INV_SQRT2 = 1.0 / math.sqrt(2.0)


def _round_up(n: int, m: int) -> int:
    return ((n + m - 1) // m) * m


def _pad2(a, rows: int, cols: int):
    pr, pc = rows - a.shape[0], cols - a.shape[1]
    if pr or pc:
        a = jnp.pad(a, ((0, pr), (0, pc)))
    return a


def _make_kernel(mxu_dtype):
    def embed_fc_kernel(x_ref, w1_ref, b1_ref, w2_ref, b2_ref, o_ref, h_ref):
        j = pl.program_id(1)

        # h = GELU(x @ W1 + b1) is computed once per batch tile (at the first
        # output-column tile) into VMEM scratch and reused across all j tiles.
        @pl.when(j == 0)
        def _():
            xv = x_ref[...].astype(mxu_dtype)
            h = jnp.dot(xv, w1_ref[...], preferred_element_type=jnp.float32)
            h = h + b1_ref[...].astype(jnp.float32)
            # Exact erf GELU (torch.nn.GELU default), in f32 on the VPU.
            h_ref[...] = 0.5 * h * (1.0 + jax.lax.erf(h * _INV_SQRT2))

        hv = h_ref[...].astype(mxu_dtype)
        o = jnp.dot(hv, w2_ref[...], preferred_element_type=jnp.float32)
        o = o + b2_ref[...].astype(jnp.float32)
        o_ref[...] = o.astype(o_ref.dtype)

    return embed_fc_kernel


def embed_fc(x, w1, b1, w2, b2, *, tm=None, tn=None, use_bf16=False,
             vmem_target_bytes=32 * 1024 * 1024,
             w2_tile_bytes=8 * 1024 * 1024):
    """Fused Linear -> GELU -> Linear.

    x : (..., input_dim)
    w1: (input_dim, emb_dim)   (transpose of PyTorch nn.Linear.weight)
    b1: (emb_dim,)
    w2: (emb_dim, emb_dim)
    b2: (emb_dim,)
    """
    orig_shape = x.shape
    d_in = orig_shape[-1]
    emb_dim = w1.shape[1]
    x2 = x.reshape(-1, d_in)
    batch = x2.shape[0]

    w_dtype = jnp.bfloat16 if use_bf16 else w1.dtype
    mxu_dtype = jnp.bfloat16 if use_bf16 else jnp.float32
    x_isz = jnp.dtype(x.dtype).itemsize
    w_isz = jnp.dtype(w_dtype).itemsize

    # ---- Feature-dim padding: weights only (activations are never padded). ----
    # Zero padding is exact: pad cols of W1/b1 give h_pad = 0, GELU(0) = 0, and
    # pad rows/cols of W2/b2 contribute 0; padded output columns are sliced off.
    e_p = _round_up(max(emb_dim, 128), 128)
    w1_p = _pad2(w1, d_in, e_p).astype(w_dtype)
    w2_p = _pad2(w2, e_p, e_p).astype(w_dtype)
    b1_p = _pad2(b1.reshape(1, emb_dim), 1, e_p).astype(jnp.float32)
    b2_p = _pad2(b2.reshape(1, emb_dim), 1, e_p).astype(jnp.float32)

    # ---- W2 column tile (second grid axis): bound per-tile W2 footprint. ----
    if tn is None:
        tn = e_p
        while e_p * tn * w_isz > w2_tile_bytes and tn % 256 == 0:
            tn //= 2
    assert e_p % tn == 0 and tn % 128 == 0
    n_j = e_p // tn

    # ---- Batch tile: big (mem-bound streaming), VMEM-budgeted, >=2 blocks
    #      whenever possible so v7x megacore gets work on both cores. ----
    if tm is None:
        tm = 512
    tm = max(1, min(tm, batch))
    if tm < batch:
        tm = max(8, _round_up(tm, 8))       # multi-block => sublane multiple
    if tm >= batch and batch >= 16:
        tm = _round_up((batch + 1) // 2, 8)  # at least two batch blocks

    def _budget(t):
        return (2 * t * d_in * x_isz                                 # x (dbl-buf)
                + 2 * t * tn * x_isz                                 # out (dbl-buf)
                + t * e_p * 4                                        # h scratch (f32)
                + d_in * e_p * w_isz                                 # W1 (1 buffer)
                + 8 * e_p * 4                                        # b1
                + (1 if n_j == 1 else 2) * e_p * tn * w_isz          # W2
                + (1 if n_j == 1 else 2) * 8 * tn * 4)               # b2

    while tm > 8 and _budget(tm) > vmem_target_bytes:
        tm = max(8, _round_up(tm // 2, 8))

    n_i = pl.cdiv(batch, tm)
    budget = _budget(tm)
    vmem_limit = int(min(64 * 1024 * 1024, max(8 * 1024 * 1024, 1.4 * budget)))

    vmem = pltpu.MemorySpace.VMEM
    resident = pl.Buffered(1)                       # single-buffer constant operands
    w2_kw = dict(pipeline_mode=resident) if n_j == 1 else {}

    cost = pl.CostEstimate(
        flops=2 * batch * (d_in * e_p + e_p * e_p),
        transcendentals=batch * e_p,
        bytes_accessed=int(batch * d_in * x_isz + batch * emb_dim * x_isz
                           + (d_in * e_p + e_p * e_p) * w_isz + 2 * e_p * 4),
    )

    out_p = pl.pallas_call(
        _make_kernel(mxu_dtype),
        out_shape=jax.ShapeDtypeStruct((batch, e_p), x.dtype),
        grid=(n_i, n_j),
        in_specs=[
            # x: streamed over the batch axis (double-buffered), feature dim unpadded.
            pl.BlockSpec((tm, d_in), lambda i, j: (i, 0), memory_space=vmem),
            # W1 / b1: constant -> single VMEM buffer, resident across all steps.
            pl.BlockSpec((d_in, e_p), lambda i, j: (0, 0), memory_space=vmem,
                         pipeline_mode=resident),
            pl.BlockSpec((1, e_p), lambda i, j: (0, 0), memory_space=vmem,
                         pipeline_mode=resident),
            # W2 / b2: N-tiled along output columns (resident if a single tile).
            pl.BlockSpec((e_p, tn), lambda i, j: (0, j), memory_space=vmem, **w2_kw),
            pl.BlockSpec((1, tn), lambda i, j: (0, j), memory_space=vmem, **w2_kw),
        ],
        out_specs=pl.BlockSpec((tm, tn), lambda i, j: (i, j), memory_space=vmem),
        scratch_shapes=[pltpu.VMEM((tm, e_p), jnp.float32)],
        compiler_params=pltpu.CompilerParams(
            dimension_semantics=("parallel", "arbitrary"),
            vmem_limit_bytes=vmem_limit,
        ),
        cost_estimate=cost,
    )(x2, w1_p, b1_p, w2_p, b2_p)

    out = out_p if e_p == emb_dim else out_p[:, :emb_dim]
    return out.reshape(*orig_shape[:-1], emb_dim)


def reference_embed_fc(x, w1, b1, w2, b2):
    h = jnp.dot(x, w1, precision="highest") + b1
    h = 0.5 * h * (1.0 + jax.lax.erf(h * _INV_SQRT2))
    return jnp.dot(h, w2, precision="highest") + b2


def _make_params(key, input_dim, emb_dim):
    k1w, k1b, k2w, k2b = jax.random.split(key, 4)
    bound1 = 1.0 / math.sqrt(input_dim)
    w1 = jax.random.uniform(k1w, (input_dim, emb_dim), jnp.float32, -bound1, bound1)
    b1 = jax.random.uniform(k1b, (emb_dim,), jnp.float32, -bound1, bound1)
    bound2 = 1.0 / math.sqrt(emb_dim)
    w2 = jax.random.uniform(k2w, (emb_dim, emb_dim), jnp.float32, -bound2, bound2)
    b2 = jax.random.uniform(k2b, (emb_dim,), jnp.float32, -bound2, bound2)
    return w1, b1, w2, b2


if __name__ == "__main__":
    key = jax.random.PRNGKey(0)
    k_a, k_b, k_c, k_d = jax.random.split(key, 4)

    # --- Case 1: canonical small EmbedFC shapes (f32, single tile) ----------
    batch, input_dim, emb_dim = 8, 32, 64
    x = jax.random.normal(k_a, (batch, input_dim), dtype=jnp.float32)
    w1, b1, w2, b2 = _make_params(k_b, input_dim, emb_dim)

    out = jax.block_until_ready(embed_fc(x, w1, b1, w2, b2))
    ref = reference_embed_fc(x, w1, b1, w2, b2)
    assert out.shape == (batch, emb_dim)
    assert jnp.allclose(out, ref, atol=1e-5, rtol=1e-5), "case 1 mismatch"

    # --- Case 2: multi-block batch (with edge tile) + N-tiled W2 path -------
    batch2, in2, emb2 = 40, 32, 256
    x2 = jax.random.normal(k_c, (batch2, in2), dtype=jnp.float32)
    w1b, b1b, w2b, b2b = _make_params(k_d, in2, emb2)

    out2 = jax.block_until_ready(embed_fc(x2, w1b, b1b, w2b, b2b, tm=16, tn=128))
    ref2 = reference_embed_fc(x2, w1b, b1b, w2b, b2b)
    assert out2.shape == (batch2, emb2)
    assert jnp.allclose(out2, ref2, atol=1e-4, rtol=1e-4), "case 2 mismatch"

    # --- Case 3: optional bf16 MXU path (f32 accumulation, f32 GELU) --------
    out3 = jax.block_until_ready(embed_fc(x, w1, b1, w2, b2, use_bf16=True))
    assert out3.shape == (batch, emb_dim)
    assert jnp.allclose(out3, ref, atol=5e-2, rtol=5e-2), "case 3 mismatch"

    print("KERNEL_OK")
</pallas_src>

<mosaic_0001>
module attributes {stable_mosaic.version = 11 : i64} {
  func.func @embed_fc_kernel(%arg0: i32, %arg1: i32, %arg2: memref<8x32xf32, #tpu.memory_space<vmem>>, %arg3: memref<32x128xf32, #tpu.memory_space<vmem>>, %arg4: memref<1x128xf32, #tpu.memory_space<vmem>>, %arg5: memref<128x128xf32, #tpu.memory_space<vmem>>, %arg6: memref<1x128xf32, #tpu.memory_space<vmem>>, %arg7: memref<8x128xf32, #tpu.memory_space<vmem>>, %arg8: memref<8x128xf32, #tpu.memory_space<vmem>>) attributes {dimension_semantics = [#tpu.dimension_semantics<parallel>, #tpu.dimension_semantics<arbitrary>], iteration_bounds = array<i64: 1, 1>, scalar_prefetch = 0 : i64, scratch_operands = 1 : i64, tpu.core_type = #tpu.core_type<tc>, window_params = [{transform_indices = @transform_0, window_bounds = array<i64: 8, 32>}, {pipeline_mode = #tpu.pipeline_mode<synchronous>, transform_indices = @transform_1, window_bounds = array<i64: 32, 128>}, {pipeline_mode = #tpu.pipeline_mode<synchronous>, transform_indices = @transform_2, window_bounds = array<i64: 1, 128>}, {pipeline_mode = #tpu.pipeline_mode<synchronous>, transform_indices = @transform_3, window_bounds = array<i64: 128, 128>}, {pipeline_mode = #tpu.pipeline_mode<synchronous>, transform_indices = @transform_4, window_bounds = array<i64: 1, 128>}, {transform_indices = @transform_5, window_bounds = array<i64: 8, 128>}]} {
    %c0_i32 = arith.constant 0 : i32
    %0 = arith.cmpi eq, %arg1, %c0_i32 : i32
    %1 = arith.extui %0 : i1 to i32
    %c0_i32_0 = arith.constant 0 : i32
    %2 = arith.cmpi ne, %1, %c0_i32_0 : i32
    scf.if %2 {
      %c0_8 = arith.constant 0 : index
      %c0_9 = arith.constant 0 : index
      %10 = vector.load %arg2[%c0_8, %c0_9] : memref<8x32xf32, #tpu.memory_space<vmem>>, vector<8x32xf32>
      %c0_10 = arith.constant 0 : index
      %c0_11 = arith.constant 0 : index
      %11 = vector.load %arg3[%c0_10, %c0_11] : memref<32x128xf32, #tpu.memory_space<vmem>>, vector<32x128xf32>
      %cst_12 = arith.constant dense<0.000000e+00> : vector<8x128xf32>
      %12 = tpu.matmul %10, %11, %cst_12 {dimension_numbers = #tpu.dot_dimension_numbers<[1], [0], [0], [1], [0, 0, 1, 1], [], []>} : vector<8x32xf32>, vector<32x128xf32>, vector<8x128xf32> -> vector<8x128xf32>
      %c0_13 = arith.constant 0 : index
      %c0_14 = arith.constant 0 : index
      %13 = vector.load %arg4[%c0_13, %c0_14] : memref<1x128xf32, #tpu.memory_space<vmem>>, vector<1x128xf32>
      %14 = vector.broadcast %13 : vector<1x128xf32> to vector<8x128xf32>
      %15 = arith.addf %12, %14 : vector<8x128xf32>
      %cst_15 = arith.constant 5.000000e-01 : f32
      %16 = vector.broadcast %cst_15 : f32 to vector<8x128xf32>
      %17 = arith.mulf %16, %15 : vector<8x128xf32>
      %cst_16 = arith.constant 0.707106769 : f32
      %18 = vector.broadcast %cst_16 : f32 to vector<8x128xf32>
      %19 = arith.mulf %15, %18 : vector<8x128xf32>
      %20 = math.erf %19 : vector<8x128xf32>
      %cst_17 = arith.constant 1.000000e+00 : f32
      %21 = vector.broadcast %cst_17 : f32 to vector<8x128xf32>
      %22 = arith.addf %21, %20 : vector<8x128xf32>
      %23 = arith.mulf %17, %22 : vector<8x128xf32>
      %c0_18 = arith.constant 0 : index
      %c0_19 = arith.constant 0 : index
      %24 = vector.load %arg8[%c0_18, %c0_19] : memref<8x128xf32, #tpu.memory_space<vmem>>, vector<8x128xf32>
      tpu.vector_store %arg8[%c0_18, %c0_19], %23 {strides = array<i32>} : memref<8x128xf32, #tpu.memory_space<vmem>>, vector<8x128xf32>,
    } else {
    }
    %c0 = arith.constant 0 : index
    %c0_1 = arith.constant 0 : index
    %3 = vector.load %arg8[%c0, %c0_1] : memref<8x128xf32, #tpu.memory_space<vmem>>, vector<8x128xf32>
    %c0_2 = arith.constant 0 : index
    %c0_3 = arith.constant 0 : index
    %4 = vector.load %arg5[%c0_2, %c0_3] : memref<128x128xf32, #tpu.memory_space<vmem>>, vector<128x128xf32>
    %cst = arith.constant dense<0.000000e+00> : vector<8x128xf32>
    %5 = tpu.matmul %3, %4, %cst {dimension_numbers = #tpu.dot_dimension_numbers<[1], [0], [0], [1], [0, 0, 1, 1], [], []>} : vector<8x128xf32>, vector<128x128xf32>, vector<8x128xf32> -> vector<8x128xf32>
    %c0_4 = arith.constant 0 : index
    %c0_5 = arith.constant 0 : index
    %6 = vector.load %arg6[%c0_4, %c0_5] : memref<1x128xf32, #tpu.memory_space<vmem>>, vector<1x128xf32>
    %7 = vector.broadcast %6 : vector<1x128xf32> to vector<8x128xf32>
    %8 = arith.addf %5, %7 : vector<8x128xf32>
    %c0_6 = arith.constant 0 : index
    %c0_7 = arith.constant 0 : index
    %9 = vector.load %arg7[%c0_6, %c0_7] : memref<8x128xf32, #tpu.memory_space<vmem>>, vector<8x128xf32>
    tpu.vector_store %arg7[%c0_6, %c0_7], %8 {strides = array<i32>} : memref<8x128xf32, #tpu.memory_space<vmem>>, vector<8x128xf32>,
    return
  }
  func.func @transform_0(%arg0: i32, %arg1: i32) -> (i32, i32) {
    %c0_i32 = arith.constant 0 : i32
    %c0_i32_0 = arith.constant 0 : i32
    return %arg0, %c0_i32 : i32, i32
  }
  func.func @transform_1(%arg0: i32, %arg1: i32) -> (i32, i32) {
    %c0_i32 = arith.constant 0 : i32
    %c0_i32_0 = arith.constant 0 : i32
    %c0_i32_1 = arith.constant 0 : i32
    return %c0_i32, %c0_i32_0 : i32, i32
  }
  func.func @transform_2(%arg0: i32, %arg1: i32) -> (i32, i32) {
    %c0_i32 = arith.constant 0 : i32
    %c0_i32_0 = arith.constant 0 : i32
    %c0_i32_1 = arith.constant 0 : i32
    return %c0_i32, %c0_i32_0 : i32, i32
  }
  func.func @transform_3(%arg0: i32, %arg1: i32) -> (i32, i32) {
    %c0_i32 = arith.constant 0 : i32
    %c0_i32_0 = arith.constant 0 : i32
    return %c0_i32, %arg1 : i32, i32
  }
  func.func @transform_4(%arg0: i32, %arg1: i32) -> (i32, i32) {
    %c0_i32 = arith.constant 0 : i32
    %c0_i32_0 = arith.constant 0 : i32
    return %c0_i32, %arg1 : i32, i32
  }
  func.func @transform_5(%arg0: i32, %arg1: i32) -> (i32, i32) {
    %c0_i32 = arith.constant 0 : i32
    return %arg0, %arg1 : i32, i32
  }
}

</mosaic_0001>

<bundles_post_ra>
// kernel: tpu_custom_call.1
= control target key start
LH: loop header
LB: loop body
LE: loop exit
PB: predicated region body
PF: predicated region fallthrough
CT: control target
= control target key end

     0   :  { %10 = vsyncpa [#allocation4], 0  ;;  %s572_s0 = inlined_call_operand.hbm [shape: f32[8,32], index: 0, kind: input, shape index: {}]   ;;  %s573_s1 = inlined_call_operand.hbm [shape: f32[32,128], index: 1, kind: input, shape index: {}]   ;;  %s574_s2 = inlined_call_operand.vmem [shape: f32[1,128], index: 2, kind: input, shape index: {}]   ;;  %s575_s3 = inlined_call_operand.hbm [shape: f32[128,128], index: 3, kind: input, shape index: {}]   ;;  %s576_s4 = inlined_call_operand.vmem [shape: f32[1,128], index: 4, kind: input, shape index: {}]   ;;  %s577_s5 = inlined_call_operand.hbm [shape: f32[8,128], index: 5, kind: output, shape index: {}]  }
   0x1   :  { %11 = vsyncpa [#allocation7], 0 }
   0x2   :  { %12 = vsyncpa [#allocation5], 0  ;;  %s473_s18 = smov [#allocation6]   ;;  %s379_s22 = scalar_lea.hbm %s573_s1, 512 }
   0x3   :  { %s28_s19 = sshll.u32 %s473_s18, 4  ;;  %p380_p0 = scmp.ne.s32.totalorder %s573_s1, %s379_s22  ;;  %s29_s19 = int_to_ptr.vmem [resolvable:$true] %s28_s19 }
   0x4   :  { %p383_p1 = scmp.lt.u32.totalorder %s379_s22, %s573_s1 }
   0x6   :  { %p385_p2 = pnand %p383_p1, %p380_p0 }
   0x8   :  { %388 = shalt.err (!%p385_p2)
}
   0x9   :  { %s389_s27 = scalar_lea.vmem %s29_s19, 512  ;;  %p394_p4 = scmp.lt.s32.totalorder %s29_s19, %s29_s19 }
   0xa   :  { %p390_p3 = scmp.ne.s32.totalorder %s29_s19, %s389_s27  ;;  %p395_p5 = scmp.lt.s32.totalorder %s389_s27, %s389_s27 }
   0xc   :  { %p396_p6 = por %p395_p5, %p394_p4 }
   0xe   :  { %p397_p7 = pnand %p396_p6, %p390_p3 }
  0x10   :  { %400 = shalt.err (!%p397_p7)
}
  0x11   :  { %s474_s28 = smov 128   ;;  %s475_s29 = smov 8  }
  0x12   :  { %34 = dma.hbm_to_vmem [thread:$0]  %s573_s1, 512, %s29_s19, [#allocation7], %s474_s28, %s474_s28, %s475_s29  }
  0x13   :  { %s476_s7 = smov [#allocation3]   ;;  %s477_s9 = smov [#allocation8]  }
  0x14   :  { %s19_s8 = sshll.u32 %s476_s7, 4  ;;  %s42_s10 = sshll.u32 %s477_s9, 4  ;;  %s20_s8 = int_to_ptr.vmem [resolvable:$true] %s19_s8  ;;  %s43_s10 = int_to_ptr.vmem [resolvable:$true] %s42_s10 }
  0x15   :  { %s401_s13 = scalar_lea.hbm %s572_s0, 128 }
  0x16   :  { %p402_p8 = scmp.ne.s32.totalorder %s572_s0, %s401_s13  ;;  %p405_p9 = scmp.lt.u32.totalorder %s401_s13, %s572_s0 }
  0x18   :  { %p407_p10 = pnand %p405_p9, %p402_p8 }
  0x1a   :  { %410 = shalt.err (!%p407_p10)
}
  0x1b   :  { %s411_s1 = scalar_lea.vmem %s20_s8, 128  ;;  %p416_p12 = scmp.lt.s32.totalorder %s20_s8, %s20_s8 }
  0x1c   :  { %p412_p11 = scmp.ne.s32.totalorder %s20_s8, %s411_s1  ;;  %p417_p13 = scmp.lt.s32.totalorder %s411_s1, %s411_s1 }
  0x1e   :  { %p418_p0 = por %p417_p13, %p416_p12 }
  0x20   :  { %p419_p1 = pnand %p418_p0, %p412_p11 }
  0x22   :  { %422 = shalt.err (!%p419_p1)
}
  0x23   :  { %22 = dma.hbm_to_vmem [thread:$0]  %s572_s0, 128, %s20_s8, [#allocation4]  }
  0x24   :  { %s423_s22 = scalar_lea.hbm %s575_s3, 2048 }
  0x25   :  { %p424_p2 = scmp.ne.s32.totalorder %s575_s3, %s423_s22  ;;  %p427_p3 = scmp.lt.u32.totalorder %s423_s22, %s575_s3 }
  0x27   :  { %p429_p4 = pnand %p427_p3, %p424_p2 }
  0x29   :  { %432 = shalt.err (!%p429_p4)
}
  0x2a   :  { %s433_s27 = scalar_lea.vmem %s43_s10, 2048  ;;  %p438_p6 = scmp.lt.s32.totalorder %s43_s10, %s43_s10 }
  0x2b   :  { %p434_p5 = scmp.ne.s32.totalorder %s43_s10, %s433_s27  ;;  %p439_p7 = scmp.lt.s32.totalorder %s433_s27, %s433_s27 }
  0x2d   :  { %p440_p8 = por %p439_p7, %p438_p6 }
  0x2f   :  { %p441_p9 = pnand %p440_p8, %p434_p5 }
  0x31   :  { %444 = shalt.err (!%p441_p9)
}
  0x32   :  { %48 = dma.hbm_to_vmem [thread:$0]  %s575_s3, 2048, %s43_s10, [#allocation7], %s474_s28, %s474_s28, %s475_s29  }
  0x33   :  { %467 = dma.done.wait [#allocation4], 128  }
  0x34   :  { %468 = vsyncadd [#allocation4], 4294967168 }
  0x35   :  { %469 = dma.done.wait [#allocation7], 2560  }
  0x36   :  { %470 = vsyncadd [#allocation7], 4294964736  ;;  %v478_v0 = vmov 0.0|0.0   ;;  %vm479_vm0 = vmmov 0   ;;  %v480_v1 = vmov 0.0   ;;  %v65_v2 = vld [vmem:[#allocation6] sm:$0xff] }
  0x37   :  { %338 = vmatprep.subr.bf16.mxu0 %v478_v0  ;;  %300 = vmatprep.mubr.msk.f32.mxu0 %vm479_vm0, %v480_v1  ;;  %v66_v3 = vld [vmem:[#allocation6 + $0x8] sm:$0xff]  ;;  %v67_v4 = vld [vmem:[#allocation6 + $0x10] sm:$0xff]  ;;  %v68_v6 = vld [vmem:[#allocation6 + $0x18] sm:$0xff]  ;;  %vm76_vm1 = vcmask 261120   ;;  %s481_s7 = smov [#allocation9]  }
  0x38   :  { %344 = vmatprep.subr.bf16.mxu1 %v478_v0  ;;  %335 = vmatprep.mubr.msk.f32.mxu1 %vm479_vm0, %v480_v1  ;;  %v339_v5 = vpack.c.bf16 %v66_v3, %v65_v2  ;;  %v157_v7 = vld [vmem:[#allocation8] sm:$0xff]  ;;  %v158_v8 = vld [vmem:[#allocation8 + $0x8] sm:$0xff]  ;;  %v159_v9 = vld [vmem:[#allocation8 + $0x10] sm:$0xff]  ;;  %v342_v11 = vpack.c.bf16 %v68_v6, %v67_v4  ;;  %s257_s8 = sshll.u32 %s481_s7, 4  ;;  %s258_s8 = int_to_ptr.vmem [resolvable:$true] %s257_s8 }
  0x39   :  { %v160_v10 = vld [vmem:[#allocation8 + $0x18] sm:$0xff]  ;;  %v345_v12 = vpack.c.bf16 %v158_v8, %v157_v7  ;;  %v161_v14 = vld [vmem:[#allocation8 + $0x20] sm:$0xff]  ;;  %v162_v15 = vld [vmem:[#allocation8 + $0x28] sm:$0xff]  ;;  %p450_p11 = scmp.lt.s32.totalorder %s258_s8, %s258_s8 }
  0x3a   :  { %340 = vmatpush3.bf16.msra.mxu0 %v339_v5  ;;  %v348_v13 = vpack.c.bf16 %v160_v10, %v159_v9  ;;  %v64_v16 = vld [vmem:[#allocation3] sm:$0xff]  ;;  %v351_v17 = vpack.c.bf16 %v162_v15, %v161_v14  ;;  %v163_v18 = vld [vmem:[#allocation8 + $0x30] sm:$0xff]  ;;  %v165_v21 = vld [vmem:[#allocation8 + $0x40] sm:$0xff] }
  0x3b   :  { %341 = vmatprep.subr.bf16.mxu0 %v478_v0  ;;  %346 = vmatpush3.bf16.msra.mxu1 %v345_v12  ;;  %v164_v19 = vld [vmem:[#allocation8 + $0x38] sm:$0xff]  ;;  %v166_v22 = vld [vmem:[#allocation8 + $0x48] sm:$0xff]  ;;  %v167_v24 = vld [vmem:[#allocation8 + $0x50] sm:$0xff] }
  0x3c   :  { %347 = vmatprep.subr.bf16.mxu1 %v478_v0  ;;  %v354_v20 = vpack.c.bf16 %v164_v19, %v163_v18  ;;  %v357_v23 = vpack.c.bf16 %v166_v22, %v165_v21  ;;  %v168_v25 = vld [vmem:[#allocation8 + $0x58] sm:$0xff]  ;;  %v169_v27 = vld [vmem:[#allocation8 + $0x60] sm:$0xff]  ;;  %v170_v28 = vld [vmem:[#allocation8 + $0x68] sm:$0xff] }
  0x3d   :  { %v360_v26 = vpack.c.bf16 %v168_v25, %v167_v24  ;;  %v363_v29 = vpack.c.bf16 %v170_v28, %v169_v27  ;;  %v171_v30 = vld [vmem:[#allocation8 + $0x70] sm:$0xff]  ;;  %v172_v31 = vld [vmem:[#allocation8 + $0x78] sm:$0xff] }
  0x3e   :  { %343 = vmatpush3.bf16.msra.mxu0 %v342_v11  ;;  %v366_v32 = vpack.c.bf16 %v172_v31, %v171_v30  ;;  %v267_v33 = vld [vmem:[%s574_s2] ss:$0 sm:$0xff]  ;;  %s445_s2 = scalar_lea.vmem %s258_s8, 128 }
  0x3f   :  { %349 = vmatpush3.bf16.msra.mxu1 %v348_v13  ;;  %v269_v42 = vld [vmem:[%s576_s4] ss:$0 sm:$0xff]  ;;  %p446_p10 = scmp.ne.s32.totalorder %s258_s8, %s445_s2  ;;  %p451_p12 = scmp.lt.s32.totalorder %s445_s2, %s445_s2 }
  0x40   :  { %350 = vmatprep.subr.bf16.mxu1 %v478_v0 }
  0x41   :  { %301 = vmatmul.mubr.msk.f32.vlgmr.msra.gmra.mrb[0].mxu0 %vm76_vm1, %v64_v16  ;;  %p452_p13 = por %p451_p12, %p450_p11 }
  0x43   :  { %352 = vmatpush3.bf16.msra.mxu1 %v351_v17  ;;  %p453_p0 = pnand %p452_p13, %p446_p10 }
  0x44   :  { %353 = vmatprep.subr.bf16.mxu1 %v478_v0 }
  0x47   :  { %355 = vmatpush3.bf16.msra.mxu1 %v354_v20 }
  0x48   :  { %356 = vmatprep.subr.bf16.mxu1 %v478_v0 }
  0x4b   :  { %358 = vmatpush3.bf16.msra.mxu1 %v357_v23 }
  0x4c   :  { %359 = vmatprep.subr.bf16.mxu1 %v478_v0 }
  0x4f   :  { %361 = vmatpush3.bf16.msra.mxu1 %v360_v26 }
  0x50   :  { %362 = vmatprep.subr.bf16.mxu1 %v478_v0 }
  0x53   :  { %364 = vmatpush3.bf16.msra.mxu1 %v363_v29 }
  0x54   :  { %365 = vmatprep.subr.bf16.mxu1 %v478_v0 }
  0x57   :  { %367 = vmatpush3.bf16.msra.mxu1 %v366_v32 }
 0x114   :  { %v146_v34 = vpop.f32.mrb[0].mxu0 }
 0x115   :  { %v147_v35 = vadd.f32 %v267_v33, %v146_v34  ;;  %v302_v36 = vpop.f32.mrb[1].mxu0 }
 0x117   :  { %v151_v37 = vmul.f32 0.70710677, %v147_v35  ;;  %v150_v39 = vmul.f32 0.5, %v147_v35 }
 0x119   :  { %377 = verf.f32 %v151_v37 }
 0x123   :  { %v378_v38 = vpop.eup %377 }
 0x124   :  { %v153_v40 = vadd.f32 1.0, %v378_v38 }
 0x126   :  { %v154_v41 = vmul.f32 %v153_v40, %v150_v39 }
 0x128   :  { %336 = vmatmul.mubr.f32.vlgmr.msra.gmra.mrb[0].mxu1 %v154_v41 }
 0x1fb   :  { %v246_v43 = vpop.f32.mrb[0].mxu1 }
 0x1fc   :  { %v247_v44 = vadd.f32 %v269_v42, %v246_v43  ;;  %v337_v45 = vpop.f32.mrb[1].mxu1 }
 0x1fe   :  { %250 = vst [vmem:[#allocation9] sm:$0xff] %v247_v44 }
 0x1ff   :  { %456 = shalt.err (!%p453_p0)
}
 0x200   :  { %s457_s11 = scalar_lea.hbm %s577_s5, 128 }
 0x201   :  { %p458_p1 = scmp.ne.s32.totalorder %s577_s5, %s457_s11  ;;  %p461_p2 = scmp.lt.u32.totalorder %s457_s11, %s577_s5 }
 0x203   :  { %p463_p3 = pnand %p461_p2, %p458_p1 }
 0x205   :  { %466 = shalt.err (!%p463_p3)
}
 0x206   :  { %260 = dma.vmem_to_hbm [thread:$0]  %s258_s8, 128, %s577_s5, [#allocation5]  }
 0x207   :  { %471 = dma.done.wait [#allocation5], 128  }
 0x208   :  { %472 = vsyncadd [#allocation5], 4294967168 }
 0x209   :  { %264 = vsyncpa [#allocation4], 1 }
 0x20a   :  { %265 = vsyncpa [#allocation7], 1 }
 0x20b   :  { %266 = vsyncpa [#allocation5], 1 }

</bundles_post_ra>
